<compile_context>
chip_gen: v7x
topology: tpu7x:2x2x1
jax: 0.10.0
libtpu: 0.0.40
codegen_flags: <defaults>
</compile_context>

<pallas_src>
import math
import functools
import numpy as np

import jax
import jax.numpy as jnp
from jax.experimental import pallas as pl
from jax.experimental.pallas import tpu as pltpu


# ----------------------------------------------------------------------------
# Pallas kernel: fused token-conv + temporal-embedding + positional-embedding
# ----------------------------------------------------------------------------
def data_embedding_kernel(x_ref, w_ref, pe_ref, *rest, TB, L, has_mark):
    f32 = jnp.float32
    if has_mark:
        mark_ref, tbl_ref, out_ref = rest
    else:
        (out_ref,) = rest

    rows = TB * L

    # --- TokenEmbedding: circular conv1d(k=3) fused into ONE MXU matmul -------------------
    # Per-batch circular shifts along the sublane (L) axis via the XLU; no wrapper pad tensor.
    x = x_ref[...]                                    # (TB, L, Cin) f32
    x_prev = pltpu.roll(x, 1, axis=1)                 # x[t-1] with per-batch wrap
    x_next = pltpu.roll(x, L - 1, axis=1)             # x[t+1] with per-batch wrap (== shift -1)
    x3 = jnp.concatenate([x_prev, x, x_next], axis=-1)        # (TB, L, 3*Cin)
    x3 = x3.reshape(rows, -1)                                  # (rows, 3*Cin)
    y = jnp.dot(x3, w_ref[...], preferred_element_type=f32)   # single K=3*Cin matmul -> (rows, D)

    # --- TemporalEmbedding (fixed sinusoid tables): multi-hot @ concatenated table --------
    if has_mark:
        mark = mark_ref[...].reshape(rows, -1)        # (rows, NF) int32, pre-clipped + pre-offset
        n_fields = mark.shape[1]
        tbl_rows = tbl_ref.shape[0]                   # padded to 128 (lane-dense K)
        lane_ids = jax.lax.broadcasted_iota(jnp.int32, (rows, tbl_rows), 1)
        mh = (lane_ids == mark[:, 0:1]).astype(f32)   # init from first compare (no zeros+add)
        for f in range(1, n_fields):                  # short static loop (<= 6 fields)
            mh = mh + (lane_ids == mark[:, f:f + 1]).astype(f32)
        y = y + jnp.dot(mh, tbl_ref[...], preferred_element_type=f32)

    # --- PositionalEmbedding + sum; dropout == identity (eval); single slab store ---------
    y = y.reshape(TB, L, -1) + pe_ref[...]            # (TB, L, D) + (L, D) broadcast
    out_ref[...] = y.astype(out_ref.dtype)


# ----------------------------------------------------------------------------
# Block-size / VMEM derivation (re-derived per call; caps chosen for v7x's 64 MiB)
# ----------------------------------------------------------------------------
def _vmem_bytes_estimate(tb, L, Cin, NF, D, TBL, has_mark):
    rows = tb * L
    blocks = tb * L * Cin * 4 + 3 * Cin * D * 4 + L * D * 4 + tb * L * D * 4
    if has_mark:
        blocks += tb * L * NF * 4 + TBL * D * 4
    temps = rows * (3 * Cin + D) * 4                  # x3 operand + f32 accumulator
    if has_mark:
        temps += rows * 2 * TBL * 4                   # multi-hot + compare temporaries
    return 2 * blocks + temps                         # double-buffered pipeline blocks + live temps


def _choose_batch_block(B, L, Cin, NF, D, TBL, has_mark,
                        target_rows=512, vmem_budget=24 << 20):
    best = 1
    for tb in range(1, B + 1):
        if B % tb:
            continue
        if B >= 2 and B // tb < 2:
            continue          # keep >= 2 grid steps so both v7x TensorCores get work
        if _vmem_bytes_estimate(tb, L, Cin, NF, D, TBL, has_mark) > vmem_budget:
            continue
        best = tb
        if tb * L >= target_rows:                     # ~>=512 lane-dense rows per step
            break
    return best


# ----------------------------------------------------------------------------
# Wrapper
# ----------------------------------------------------------------------------
def data_embedding_forward(x, x_mark, conv_w, pe_full, tables, offsets, sizes,
                           *, out_dtype=jnp.float32):
    """x: (B, L, c_in) f32, x_mark: (B, L, n_fields) or None -> (B, L, d_model)."""
    B, L, Cin = x.shape
    K3, D = conv_w.shape
    has_mark = x_mark is not None
    TBL = tables.shape[0]
    NF = 0 if x_mark is None else x_mark.shape[-1]
    pe = pe_full[:L]

    TB = _choose_batch_block(B, L, Cin, NF, D, TBL, has_mark)
    est = _vmem_bytes_estimate(TB, L, Cin, NF, D, TBL, has_mark)
    vmem_limit = int(min(max(4 * est, 32 << 20), 64 << 20))

    operands = [x, conv_w, pe]
    in_specs = [
        pl.BlockSpec((TB, L, Cin), lambda b: (b, 0, 0)),
        pl.BlockSpec((K3, D), lambda b: (0, 0)),
        pl.BlockSpec((L, D), lambda b: (0, 0)),
    ]
    if has_mark:
        # clip each field into its sub-table range (matches gather-clamp semantics), then offset
        mark = (jnp.clip(x_mark.astype(jnp.int32), 0, sizes[None, None, :] - 1)
                + offsets[None, None, :])
        operands += [mark, tables]
        in_specs += [
            pl.BlockSpec((TB, L, NF), lambda b: (b, 0, 0)),
            pl.BlockSpec((TBL, D), lambda b: (0, 0)),
        ]

    kernel = functools.partial(data_embedding_kernel, TB=TB, L=L, has_mark=has_mark)
    return pl.pallas_call(
        kernel,
        out_shape=jax.ShapeDtypeStruct((B, L, D), out_dtype),
        grid_spec=pltpu.PrefetchScalarGridSpec(
            num_scalar_prefetch=0,
            grid=(B // TB,),
            in_specs=in_specs,
            out_specs=pl.BlockSpec((TB, L, D), lambda b: (b, 0, 0)),
        ),
        compiler_params=pltpu.CompilerParams(
            dimension_semantics=("parallel",),
            vmem_limit_bytes=vmem_limit,
        ),
    )(*operands)


# ----------------------------------------------------------------------------
# Parameter construction (mirrors the PyTorch module)
# ----------------------------------------------------------------------------
def _sinusoid_table(n, d_model):
    """FixedEmbedding / PositionalEmbedding table: w[p, 2i]=sin(p*dt_i), w[p, 2i+1]=cos(p*dt_i)."""
    pos = np.arange(n, dtype=np.float32)[:, None]
    div = np.exp(np.arange(0, d_model, 2, dtype=np.float32) * -(math.log(10000.0) / d_model))
    t = np.zeros((n, d_model), np.float32)
    t[:, 0::2] = np.sin(pos * div)
    t[:, 1::2] = np.cos(pos * div)
    return jnp.asarray(t)


class DataEmbeddingPallas:
    """DataEmbedding with embed_type='fixed', freq='h'. Dropout is identity (eval mode)."""

    def __init__(self, c_in, d_model, embed_type="fixed", freq="h", max_len=5000, key=None):
        assert d_model % 2 == 0, "d_model must be even (sin/cos interleave)"
        if embed_type != "fixed" or freq != "h":
            # TODO(synk): wire minute/second tables (freq 't'/'s') and the 'timeF' Linear variant.
            raise NotImplementedError("only embed_type='fixed', freq='h' is implemented")

        # TokenEmbedding conv weight: torch (d_model, c_in, 3), kaiming_normal_(fan_in, leaky_relu)
        fan_in = c_in * 3
        gain = math.sqrt(2.0 / (1.0 + 0.01 ** 2))
        std = gain / math.sqrt(fan_in)
        w = jax.random.normal(key, (d_model, c_in, 3), jnp.float32) * std
        w3 = jnp.transpose(w, (2, 1, 0))                 # (3, c_in, d_model), tap-major
        self.conv_w3 = w3                                # kept for the pure-JAX reference
        self.conv_w = w3.reshape(3 * c_in, d_model)      # fused (3*c_in, d_model) for ONE matmul

        # PositionalEmbedding table (sliced to L at call time)
        self.pe = _sinusoid_table(max_len, d_model)

        # TemporalEmbedding fixed tables, field order = x_mark columns [month, day, weekday, hour]
        sizes = [13, 32, 7, 24]
        cat = jnp.concatenate([_sinusoid_table(s, d_model) for s in sizes], axis=0)   # (76, D)
        total = int(cat.shape[0])
        tbl_rows = max(128, ((total + 127) // 128) * 128)   # lane-dense contraction dim
        self.tables = jnp.zeros((tbl_rows, d_model), jnp.float32).at[:total].set(cat)
        self.offsets = jnp.asarray(np.cumsum([0] + sizes[:-1]), jnp.int32)            # [0,13,45,52]
        self.sizes = jnp.asarray(sizes, jnp.int32)

    def __call__(self, x, x_mark=None, out_dtype=jnp.float32):
        return data_embedding_forward(x, x_mark, self.conv_w, self.pe, self.tables,
                                      self.offsets, self.sizes, out_dtype=out_dtype)


# ----------------------------------------------------------------------------
# Pure-JAX reference for correctness check
# ----------------------------------------------------------------------------
def reference_forward(x, x_mark, conv_w3, pe_full, tables, offsets, sizes):
    B, L, Cin = x.shape
    hi = jax.lax.Precision.HIGHEST
    val = (jnp.einsum("blc,cd->bld", jnp.roll(x, 1, axis=1), conv_w3[0], precision=hi)
           + jnp.einsum("blc,cd->bld", x, conv_w3[1], precision=hi)
           + jnp.einsum("blc,cd->bld", jnp.roll(x, -1, axis=1), conv_w3[2], precision=hi))
    out = val + pe_full[:L][None]
    if x_mark is not None:
        idx = (jnp.clip(x_mark.astype(jnp.int32), 0, sizes[None, None, :] - 1)
               + offsets[None, None, :])
        out = out + jnp.take(tables, idx, axis=0).sum(axis=2)
    return out


if __name__ == "__main__":
    B, L = 8, 32
    c_in, d_model = 7, 128          # d_model lane-dense (full 128 lanes)

    key = jax.random.PRNGKey(0)
    kx, km1, km2, km3, km4, kw = jax.random.split(key, 6)
    x = jax.random.normal(kx, (B, L, c_in), jnp.float32)
    month = jax.random.randint(km1, (B, L, 1), 0, 13)
    day = jax.random.randint(km2, (B, L, 1), 0, 32)
    weekday = jax.random.randint(km3, (B, L, 1), 0, 7)
    hour = jax.random.randint(km4, (B, L, 1), 0, 24)
    x_mark = jnp.concatenate([month, day, weekday, hour], axis=-1).astype(jnp.float32)

    emb = DataEmbeddingPallas(c_in, d_model, freq="h", key=kw)

    # full forward: value + temporal + positional
    y = jax.block_until_ready(emb(x, x_mark))
    y_ref = reference_forward(x, x_mark, emb.conv_w3, emb.pe, emb.tables, emb.offsets, emb.sizes)
    np.testing.assert_allclose(np.asarray(y), np.asarray(y_ref), rtol=1e-4, atol=1e-4)

    # x_mark is None branch: value + positional only (temporal matmul skipped at trace time)
    y0 = jax.block_until_ready(emb(x, None))
    y0_ref = reference_forward(x, None, emb.conv_w3, emb.pe, emb.tables, emb.offsets, emb.sizes)
    np.testing.assert_allclose(np.asarray(y0), np.asarray(y0_ref), rtol=1e-4, atol=1e-4)

    print("KERNEL_OK")
</pallas_src>

<mosaic_0001>
module attributes {stable_mosaic.version = 11 : i64} {
  func.func @data_embedding_kernel(%arg0: i32, %arg1: memref<4x32x7xf32, #tpu.memory_space<vmem>>, %arg2: memref<21x128xf32, #tpu.memory_space<vmem>>, %arg3: memref<32x128xf32, #tpu.memory_space<vmem>>, %arg4: memref<4x32x4xi32, #tpu.memory_space<vmem>>, %arg5: memref<128x128xf32, #tpu.memory_space<vmem>>, %arg6: memref<4x32x128xf32, #tpu.memory_space<vmem>>) attributes {dimension_semantics = [#tpu.dimension_semantics<parallel>], iteration_bounds = array<i64: 2>, scalar_prefetch = 0 : i64, scratch_operands = 0 : i64, tpu.core_type = #tpu.core_type<tc>, window_params = [{transform_indices = @transform_0, window_bounds = array<i64: 4, 32, 7>}, {pipeline_mode = #tpu.pipeline_mode<synchronous>, transform_indices = @transform_1, window_bounds = array<i64: 21, 128>}, {pipeline_mode = #tpu.pipeline_mode<synchronous>, transform_indices = @transform_2, window_bounds = array<i64: 32, 128>}, {transform_indices = @transform_3, window_bounds = array<i64: 4, 32, 4>}, {pipeline_mode = #tpu.pipeline_mode<synchronous>, transform_indices = @transform_4, window_bounds = array<i64: 128, 128>}, {transform_indices = @transform_5, window_bounds = array<i64: 4, 32, 128>}]} {
    %c0 = arith.constant 0 : index
    %c0_0 = arith.constant 0 : index
    %c0_1 = arith.constant 0 : index
    %0 = vector.load %arg1[%c0, %c0_0, %c0_1] : memref<4x32x7xf32, #tpu.memory_space<vmem>>, vector<4x32x7xf32>
    %c1_i32 = arith.constant 1 : i32
    %1 = tpu.dynamic_rotate %0 by %c1_i32 dim 1 : vector<4x32x7xf32>, i32 -> vector<4x32x7xf32>
    %c31_i32 = arith.constant 31 : i32
    %2 = tpu.dynamic_rotate %0 by %c31_i32 dim 1 : vector<4x32x7xf32>, i32 -> vector<4x32x7xf32>
    %3 = tpu.concatenate %1, %0, %2 in 2 : vector<4x32x7xf32>, vector<4x32x7xf32>, vector<4x32x7xf32> -> vector<4x32x21xf32>
    %4 = vector.shape_cast %3 : vector<4x32x21xf32> to vector<128x21xf32>
    %c0_2 = arith.constant 0 : index
    %c0_3 = arith.constant 0 : index
    %5 = vector.load %arg2[%c0_2, %c0_3] : memref<21x128xf32, #tpu.memory_space<vmem>>, vector<21x128xf32>
    %cst = arith.constant dense<0.000000e+00> : vector<128x128xf32>
    %6 = tpu.matmul %4, %5, %cst {dimension_numbers = #tpu.dot_dimension_numbers<[1], [0], [0], [1], [0, 0, 1, 1], [], []>} : vector<128x21xf32>, vector<21x128xf32>, vector<128x128xf32> -> vector<128x128xf32>
    %c0_4 = arith.constant 0 : index
    %c0_5 = arith.constant 0 : index
    %c0_6 = arith.constant 0 : index
    %7 = vector.load %arg4[%c0_4, %c0_5, %c0_6] : memref<4x32x4xi32, #tpu.memory_space<vmem>>, vector<4x32x4xi32>
    %8 = vector.shape_cast %7 : vector<4x32x4xi32> to vector<128x4xi32>
    %9 = tpu.iota {dimensions = array<i32: 1>} : vector<128x128xi32>
    %10 = vector.extract_strided_slice %8 {offsets = [0, 0], sizes = [128, 1], strides = [1, 1]} : vector<128x4xi32> to vector<128x1xi32>
    %11 = vector.broadcast %10 : vector<128x1xi32> to vector<128x128xi32>
    %12 = arith.cmpi eq, %9, %11 : vector<128x128xi32>
    %13 = arith.extui %12 : vector<128x128xi1> to vector<128x128xi32>
    %14 = arith.sitofp %13 : vector<128x128xi32> to vector<128x128xf32>
    %15 = vector.extract_strided_slice %8 {offsets = [0, 1], sizes = [128, 1], strides = [1, 1]} : vector<128x4xi32> to vector<128x1xi32>
    %16 = vector.broadcast %15 : vector<128x1xi32> to vector<128x128xi32>
    %17 = arith.cmpi eq, %9, %16 : vector<128x128xi32>
    %18 = arith.extui %17 : vector<128x128xi1> to vector<128x128xi32>
    %19 = arith.sitofp %18 : vector<128x128xi32> to vector<128x128xf32>
    %20 = arith.addf %14, %19 : vector<128x128xf32>
    %21 = vector.extract_strided_slice %8 {offsets = [0, 2], sizes = [128, 1], strides = [1, 1]} : vector<128x4xi32> to vector<128x1xi32>
    %22 = vector.broadcast %21 : vector<128x1xi32> to vector<128x128xi32>
    %23 = arith.cmpi eq, %9, %22 : vector<128x128xi32>
    %24 = arith.extui %23 : vector<128x128xi1> to vector<128x128xi32>
    %25 = arith.sitofp %24 : vector<128x128xi32> to vector<128x128xf32>
    %26 = arith.addf %20, %25 : vector<128x128xf32>
    %27 = vector.extract_strided_slice %8 {offsets = [0, 3], sizes = [128, 1], strides = [1, 1]} : vector<128x4xi32> to vector<128x1xi32>
    %28 = vector.broadcast %27 : vector<128x1xi32> to vector<128x128xi32>
    %29 = arith.cmpi eq, %9, %28 : vector<128x128xi32>
    %30 = arith.extui %29 : vector<128x128xi1> to vector<128x128xi32>
    %31 = arith.sitofp %30 : vector<128x128xi32> to vector<128x128xf32>
    %32 = arith.addf %26, %31 : vector<128x128xf32>
    %c0_7 = arith.constant 0 : index
    %c0_8 = arith.constant 0 : index
    %33 = vector.load %arg5[%c0_7, %c0_8] : memref<128x128xf32, #tpu.memory_space<vmem>>, vector<128x128xf32>
    %cst_9 = arith.constant dense<0.000000e+00> : vector<128x128xf32>
    %34 = tpu.matmul %32, %33, %cst_9 {dimension_numbers = #tpu.dot_dimension_numbers<[1], [0], [0], [1], [0, 0, 1, 1], [], []>} : vector<128x128xf32>, vector<128x128xf32>, vector<128x128xf32> -> vector<128x128xf32>
    %35 = arith.addf %6, %34 : vector<128x128xf32>
    %36 = vector.shape_cast %35 : vector<128x128xf32> to vector<4x32x128xf32>
    %c0_10 = arith.constant 0 : index
    %c0_11 = arith.constant 0 : index
    %37 = vector.load %arg3[%c0_10, %c0_11] : memref<32x128xf32, #tpu.memory_space<vmem>>, vector<32x128xf32>
    %38 = vector.shape_cast %37 : vector<32x128xf32> to vector<1x32x128xf32>
    %39 = vector.broadcast %38 : vector<1x32x128xf32> to vector<4x32x128xf32>
    %40 = arith.addf %36, %39 : vector<4x32x128xf32>
    %c0_12 = arith.constant 0 : index
    %c0_13 = arith.constant 0 : index
    %c0_14 = arith.constant 0 : index
    %41 = vector.load %arg6[%c0_12, %c0_13, %c0_14] : memref<4x32x128xf32, #tpu.memory_space<vmem>>, vector<4x32x128xf32>
    tpu.vector_store %arg6[%c0_12, %c0_13, %c0_14], %40 {strides = array<i32>} : memref<4x32x128xf32, #tpu.memory_space<vmem>>, vector<4x32x128xf32>,
    return
  }
  func.func @transform_0(%arg0: i32) -> (i32, i32, i32) {
    %c0_i32 = arith.constant 0 : i32
    %c0_i32_0 = arith.constant 0 : i32
    %c0_i32_1 = arith.constant 0 : i32
    return %arg0, %c0_i32, %c0_i32_0 : i32, i32, i32
  }
  func.func @transform_1(%arg0: i32) -> (i32, i32) {
    %c0_i32 = arith.constant 0 : i32
    %c0_i32_0 = arith.constant 0 : i32
    %c0_i32_1 = arith.constant 0 : i32
    return %c0_i32, %c0_i32_0 : i32, i32
  }
  func.func @transform_2(%arg0: i32) -> (i32, i32) {
    %c0_i32 = arith.constant 0 : i32
    %c0_i32_0 = arith.constant 0 : i32
    %c0_i32_1 = arith.constant 0 : i32
    return %c0_i32, %c0_i32_0 : i32, i32
  }
  func.func @transform_3(%arg0: i32) -> (i32, i32, i32) {
    %c0_i32 = arith.constant 0 : i32
    %c0_i32_0 = arith.constant 0 : i32
    %c0_i32_1 = arith.constant 0 : i32
    return %arg0, %c0_i32, %c0_i32_0 : i32, i32, i32
  }
  func.func @transform_4(%arg0: i32) -> (i32, i32) {
    %c0_i32 = arith.constant 0 : i32
    %c0_i32_0 = arith.constant 0 : i32
    %c0_i32_1 = arith.constant 0 : i32
    return %c0_i32, %c0_i32_0 : i32, i32
  }
  func.func @transform_5(%arg0: i32) -> (i32, i32, i32) {
    %c0_i32 = arith.constant 0 : i32
    %c0_i32_0 = arith.constant 0 : i32
    %c0_i32_1 = arith.constant 0 : i32
    return %arg0, %c0_i32, %c0_i32_0 : i32, i32, i32
  }
}

</mosaic_0001>

<bundles_post_ra>
// kernel: tpu_custom_call.1
= control target key start
LH: loop header
LB: loop body
LE: loop exit
PB: predicated region body
PF: predicated region fallthrough
CT: control target
= control target key end

     0   :  { %10 = vsyncpa [#allocation3], 0  ;;  %s2856_s0 = inlined_call_operand.vmem [shape: f32[8,32,7], index: 0, kind: input, shape index: {}]   ;;  %s2857_s1 = inlined_call_operand.vmem [shape: f32[21,128], index: 1, kind: input, shape index: {}]   ;;  %s2858_s2 = inlined_call_operand.vmem [shape: f32[32,128], index: 2, kind: input, shape index: {}]   ;;  %s2859_s3 = inlined_call_operand.vmem [shape: s32[8,32,4], index: 3, kind: input, shape index: {}]   ;;  %s2860_s4 = inlined_call_operand.vmem [shape: f32[128,128], index: 4, kind: input, shape index: {}]   ;;  %s2861_s5 = inlined_call_operand.hbm [shape: f32[8,32,128], index: 5, kind: output, shape index: {}]  }
   0x1   :  { %12 = vsyncpa [#allocation3 + $0x1], 0  ;;  %s1923_s18 = smov 0   ;;  %s1925_s19 = smov 0  }
   0x2   :  { %s1927_s20 = smov 0   ;;  %s1929_s21 = smov 0  }
   0x3 LB: > { %s1944_s22 = sadd.s32 4294967295, %s1881_s21   ;;  %s1437_s23 = sadd.s32 4294967294, %s1881_s21   ;;  %s1881_s21 = sphi %s1929_s21, %s2880_s21   ;;  %s1877_s20 = sphi %s1927_s20, %s2879_s20   ;;  %s1873_s19 = sphi %s1925_s19, %s2878_s19   ;;  %s1869_s18 = sphi %s1923_s18, %s2877_s18  }
   0x4   : > { %s1948_s24 = sadd.s32 1, %s1881_s21   ;;  %s140_s25 = sadd.s32 1, %s1877_s20 }
   0x5   : > { %s137_s26 = ssub.s32 %s1881_s21, %s1948_s24  ;;  %p150_p0 = scmp.ne.s32.totalorder %s1877_s20, %s1873_s19 }
   0x6   : > { %p138_p1 = scmp.eq.s32.totalorder %s137_s26, 0  ;;  %p151_p2 = scmp.eq.s32.totalorder %s1944_s22, 1 }
   0x7   : > { %p156_p3 = scmp.ne.s32.totalorder %s1873_s19, %s1869_s18  ;;  %p157_p4 = scmp.eq.s32.totalorder %s1437_s23, 1 }
   0x8   : > { %s1959_s27 = scalar_select %p138_p1, %s1877_s20, %s140_s25  }
   0x9   : > { %p1961_p5 = por %p151_p2, %p150_p0  ;;  %p1965_p6 = por %p157_p4, %p156_p3 }
   0xa   : > { %p1440_p7 = scmp.ge.s32.totalorder %s1881_s21, 1  ;;  %p204_p8 = scmp.lt.s32.totalorder %s1881_s21, 3 }
   0xc   : > { %p205_p9 = pnand %p1440_p7, %p204_p8 }
   0xd   : > { %s1442_s30 = sshll.u32 (!%p205_p9), %s1944_s22, 2  ;;  %v1883_v0 = vmov (!%p205_p9), 2   ;;  %v1884_v1 = vmov (!%p205_p9), 0   ;;  %v286_v4 = vlaneseq (!%p205_p9)  ;;  %v1885_v5 = vmov (!%p205_p9), 1   ;;  %s1886_s13 = smov (!%p205_p9), 14   ;;  %v953_v41 = vld [vmem:[%s2860_s4] sm:$0xff] (!%p205_p9) }
   0xe   : > { %208 = sbr.rel (%p205_p9) target bundleno = 638 (0x27e), region = 40  ;;  %1779 = vset.pattern.permute.xlu0 (!%p205_p9), %v1883_v0  ;;  %1776 = vset.pattern.permute.xlu1 (!%p205_p9), %v1884_v1  ;;  %p240_p10 = scmp.lt.s32.totalorder (!%p205_p9), %s1442_s30, 7  ;;  %v954_v42 = vld [vmem:[%s2860_s4 + $0x8] sm:$0xff] (!%p205_p9)  ;;  %v500_v43 = vld [vmem:[%s2857_s1] sm:$0xff] (!%p205_p9)  ;;  %v1888_v46 = vmov (!%p205_p9), 3   ;;  %v955_v49 = vld [vmem:[%s2860_s4 + $0x10] sm:$0xff] (!%p205_p9) }
   0xf   : > { %v2008_v10 = vshrl.u32 (!%p205_p9), %v286_v4, 7  ;;  %s1887_s14 = smov (!%p205_p9), 7   ;;  %v1676_v44 = vpack.c.bf16 (!%p205_p9), %v954_v42, %v953_v41  ;;  %v501_v45 = vld [vmem:[%s2857_s1 + $0x8] sm:$0xff] (!%p205_p9)  ;;  %v956_v50 = vld [vmem:[%s2860_s4 + $0x18] sm:$0xff] (!%p205_p9)  ;;  %v502_v52 = vld [vmem:[%s2857_s1 + $0x10] sm:$0x1f] (!%p205_p9) }
  0x10   : > { %v1708_v47 = vpack.c.bf16 (!%p205_p9), %v501_v45, %v500_v43  ;;  %v1680_v51 = vpack.c.bf16 (!%p205_p9), %v956_v50, %v955_v49  ;;  %vm1163_vm1 = vcmask (!%p205_p9), 1044480   ;;  %v957_v54 = vld [vmem:[%s2860_s4 + $0x20] sm:$0xff] (!%p205_p9)  ;;  %v958_v55 = vld [vmem:[%s2860_s4 + $0x28] sm:$0xff] (!%p205_p9)  ;;  %v959_v58 = vld [vmem:[%s2860_s4 + $0x30] sm:$0xff] (!%p205_p9)  ;;  %vm466_vm4 = vcmask (!%p205_p9), 56320   ;;  %s1538_s7 = sshll.u32 (!%p205_p9), %s1944_s22, 11 }
  0x11   : > { %vm321_vm0 = vcmp.lt.s32.totalorder (!%p205_p9), %v2008_v10, 7  ;;  %1677 = vmatprep.subr.bf16.mxu1 (!%p205_p9), %v1676_v44  ;;  %v1684_v56 = vpack.c.bf16 (!%p205_p9), %v958_v55, %v957_v54  ;;  %v960_v59 = vld [vmem:[%s2860_s4 + $0x38] sm:$0xff] (!%p205_p9)  ;;  %v961_v62 = vld [vmem:[%s2860_s4 + $0x40] sm:$0xff] (!%p205_p9)  ;;  %v962_v63 = vld [vmem:[%s2860_s4 + $0x48] sm:$0xff] (!%p205_p9)  ;;  %vm288_vm2 = vcmp.lt.s32.totalorder (!%p205_p9), %v2008_v10, 1  ;;  %vm483_vm6 = vcmask (!%p205_p9), 113664   ;;  %s2806_s15 = scalar_lea.hbm (!%p205_p9), %s2861_s5, %s1538_s7 }
  0x12   : > { %1709 = vmatprep.subr.bf16.mxu0 (!%p205_p9), %v1708_v47  ;;  %1679 = vmatpush3.bf16.msra.mxu1 (!%p205_p9), %v1676_v44  ;;  %v1688_v60 = vpack.c.bf16 (!%p205_p9), %v960_v59, %v959_v58  ;;  %vm1114_vm10 = vcmask (!%p205_p9), 171008  }
  0x13   : > { %1711 = vmatpush3.bf16.msra.mxu0 (!%p205_p9), %v1708_v47  ;;  %1681 = vmatprep.subr.bf16.mxu1 (!%p205_p9), %v1680_v51 }
  0x14   : > { %1650 = vmatprep.subr.msk.mxu0 (!%p205_p9), %vm1163_vm1, %v502_v52 }
  0x15   : > { %s2882_s30 = smov (!%p240_p10, %s1442_s30), 7 }
  0x16   : > { %s1535_s6 = sshll.u32 %s2882_s30, 5  ;;  %1683 = vmatpush3.bf16.msra.mxu1 %v1680_v51 }
  0x17   : > { %s1977_s9 = scalar_lea.vmem %s2859_s3, %s1535_s6  ;;  %s1990_s12 = scalar_lea.vmem %s2856_s0, %s1535_s6  ;;  %1651 = vmatpush3.msk.msra.mxu0 %vm1163_vm1, %v502_v52  ;;  %1685 = vmatprep.subr.bf16.mxu1 %v1684_v56 }
  0x18   : > { %v1980_v2 = vld [vmem:[%s1977_s9 + $0x8] sm:$0xff]  ;;  %v1985_v3 = vld [vmem:[%s1977_s9 + $0x18] sm:$0xff]  ;;  %v1999_v7 = vld [vmem:[%s1977_s9] sm:$0xff] }
  0x19   : > { %733 = vperm.xlu0 %1779, %v1980_v2   ;;  %525 = vperm.xlu1 %1776, %v1980_v2   ;;  %v1996_v6 = vld [vmem:[%s1977_s9 + $0x28] sm:$0xff]  ;;  %v2002_v8 = vld [vmem:[%s1990_s12] sm:$0xff]  ;;  %v2017_v13 = vld [vmem:[%s1990_s12 + $0x10] sm:$0xff] }
  0x1a   : > { %v2005_v9 = vld [vmem:[%s1990_s12 + $0x8] sm:$0xff]  ;;  %v305_v11 = vrot.slane %v2002_v8, 1  ;;  %v2021_v14 = vld [vmem:[%s1977_s9 + $0x10] sm:$0xff]  ;;  %v313_v16 = vrot.slane %v2017_v13, 1  ;;  %v2036_v18 = vld [vmem:[%s1977_s9 + $0x40] sm:$0xff]  ;;  %1687 = vmatpush3.bf16.msra.mxu1 %v1684_v56 }
  0x1b   : > { %v309_v12 = vrot.slane %v2005_v9, 1  ;;  %v2039_v19 = vld [vmem:[%s1990_s12 + $0x18] sm:$0xff]  ;;  %v2058_v23 = vld [vmem:[%s1977_s9 + $0x20] sm:$0xff]  ;;  %v2061_v24 = vld [vmem:[%s1977_s9 + $0x50] sm:$0xff]  ;;  %1689 = vmatprep.subr.bf16.mxu1 %v1688_v60 }
  0x1c   : > { %v317_v20 = vrot.slane %v2039_v19, 1  ;;  %v2065_v25 = vld [vmem:[%s1990_s12 + $0x20] sm:$0xff]  ;;  %v2068_v26 = vld [vmem:[%s1990_s12 + $0x28] sm:$0xff]  ;;  %v2075_v29 = vld [vmem:[%s1990_s12 + $0x30] sm:$0xff] }
  0x1d   : > { %739 = vperm.xlu0 %1779, %v1985_v3   ;;  %1777 = vset.pattern.permute.xlu1 %v1885_v5  ;;  %v330_v15 = vsel %vm321_vm0, %v305_v11, %v309_v12  ;;  %v326_v17 = vsel %vm321_vm0, %v309_v12, %v313_v16  ;;  %v306_v27 = vrot.slane %v2065_v25, 1  ;;  %v310_v28 = vrot.slane %v2068_v26, 1  ;;  %v2092_v33 = vld [vmem:[%s1977_s9 + $0x60] sm:$0xff]  ;;  %v2096_v34 = vld [vmem:[%s1990_s12 + $0x38] sm:$0xff]  ;;  %v2105_v36 = vld [vmem:[%s1977_s9 + $0x30] sm:$0xff] }
  0x1e   : > { %621 = vperm.xlu1 %1777, %v1980_v2   ;;  %v322_v21 = vsel %vm321_vm0, %v313_v16, %v317_v20  ;;  %v334_v22 = vsel %vm321_vm0, %v317_v20, %v305_v11  ;;  %v314_v31 = vrot.slane %v2075_v29, 1  ;;  %v318_v35 = vrot.slane %v2096_v34, 1  ;;  %v2118_v39 = vld [vmem:[%s1977_s9 + $0x70] sm:$0xff]  ;;  %v2125_v40 = vld [vmem:[%s1977_s9 + $0x38] sm:$0xff]  ;;  %v2146_v48 = vld [vmem:[%s1977_s9 + $0x48] sm:$0xff]  ;;  %1691 = vmatpush3.bf16.msra.mxu1 %v1688_v60 }
  0x1f   : > { %v331_v30 = vsel %vm321_vm0, %v306_v27, %v310_v28  ;;  %v2161_v53 = vld [vmem:[%s1977_s9 + $0x58] sm:$0xff]  ;;  %v2173_v57 = vld [vmem:[%s1977_s9 + $0x68] sm:$0xff]  ;;  %v2184_v61 = vld [vmem:[%s1990_s12 + $0x40] sm:$0xff] }
  0x20   : > { %v327_v32 = vsel %vm321_vm0, %v310_v28, %v314_v31  ;;  %v323_v37 = vsel %vm321_vm0, %v314_v31, %v318_v35  ;;  %v335_v38 = vsel %vm321_vm0, %v318_v35, %v306_v27  ;;  %v2196_v11 = vld [vmem:[%s1977_s9 + $0x78] sm:$0xff]  ;;  %v963_v12 = vld [vmem:[%s2860_s4 + $0x50] sm:$0xff]  ;;  %v966_v20 = vld [vmem:[%s2860_s4 + $0x68] sm:$0xff] }
  0x21   : > { %745 = vperm.xlu0 %1779, %v1996_v6   ;;  %v968_v27 = vld [vmem:[%s2860_s4 + $0x78] sm:$0xff]  ;;  %v2235_v31 = vld [vmem:[%s1990_s12 + $0x48] sm:$0xff]  ;;  %v2274_v45 = vld [vmem:[%s1990_s12 + $0x70] sm:$0xff] }
  0x22   : > { %1778 = vset.pattern.permute.xlu1 %v1883_v0  ;;  %v2277_v47 = vld [vmem:[%s1990_s12 + $0x78] sm:$0xff]  ;;  %v316_v51 = vrot.slane %v2274_v45, 1 }
  0x23   : > { %730 = vperm.xlu1 %1778, %v1999_v7   ;;  %v320_v52 = vrot.slane %v2277_v47, 1 }
  0x25   : > { %1790 = vset.pattern.permute.xlu0 %v1884_v1  ;;  %v2290_v54 = vsel %vm321_vm0, %v316_v51, %v320_v52 }
  0x26   : > { %522 = vperm.xlu0 %1790, %v1999_v7  }
  0x27   : > { %1780 = vset.pattern.permute.xlu1 %v1884_v1 }
  0x28   : > { %528 = vperm.xlu1 %1780, %v2021_v14  }
  0x2a   : > { %418 = vrot.lane.b32.xlu0 %v330_v15, %s1886_s13  ;;  %v964_v15 = vld [vmem:[%s2860_s4 + $0x58] sm:$0xff] }
  0x2b   : > { %v1696_v16 = vpack.c.bf16 %v964_v15, %v963_v12 }
  0x2c   : > { %1781 = vset.pattern.permute.xlu1 %v1885_v5 }
  0x2d   : > { %624 = vperm.xlu1 %1781, %v2021_v14  }
  0x2e   : > { %420 = vrot.lane.b32.xlu0 %v326_v17, %s1886_s13  ;;  %v965_v17 = vld [vmem:[%s2860_s4 + $0x60] sm:$0xff] }
  0x31   : > { %1782 = vset.pattern.permute.xlu1 %v1884_v1 }
  0x32   : > { %531 = vperm.xlu1 %1782, %v1985_v3   ;;  %546 = vperm.xlu0 %1790, %v2036_v18  }
  0x36   : > { %1783 = vset.pattern.permute.xlu1 %v1885_v5  ;;  %358 = vrot.lane.b32.xlu0 %v2017_v13, %s1887_s14 }
  0x37   : > { %627 = vperm.xlu1 %1783, %v1985_v3  }
  0x3a   : > { %422 = vrot.lane.b32.xlu0 %v322_v21, %s1886_s13  ;;  %v1700_v21 = vpack.c.bf16 %v966_v20, %v965_v17 }
  0x3b   : > { %1784 = vset.pattern.permute.xlu1 %v1883_v0 }
  0x3c   : > { %736 = vperm.xlu1 %1784, %v2021_v14  }
  0x3e   : > { %424 = vrot.lane.b32.xlu0 %v334_v22, %s1886_s13  ;;  %v967_v22 = vld [vmem:[%s2860_s4 + $0x70] sm:$0xff] }
  0x3f   : > { %v1704_v28 = vpack.c.bf16 %v968_v27, %v967_v22  ;;  %v2862_v27 = vrot.slane %v2065_v25, 7 }
  0x40   : > { %1785 = vset.pattern.permute.xlu1 %v1884_v1 }
  0x41   : > { %534 = vperm.xlu1 %1785, %v2058_v23  }
  0x42   : > { %552 = vperm.xlu0 %1790, %v2061_v24  }
  0x45   : > { %1786 = vset.pattern.permute.xlu1 %v1885_v5 }
  0x46   : > { %630 = vperm.xlu1 %1786, %v2058_v23   ;;  %362 = vrot.lane.b32.xlu0 %v2065_v25, %s1887_s14 }
  0x4a   : > { %1787 = vset.pattern.permute.xlu1 %v1884_v1  ;;  %426 = vrot.lane.b32.xlu0 %v331_v30, %s1886_s13  ;;  %v2230_v30 = vld [vmem:[%s1990_s12 + $0x58] sm:$0xff] }
  0x4b   : > { %537 = vperm.xlu1 %1787, %v1996_v6  }
  0x4e   : > { %428 = vrot.lane.b32.xlu0 %v327_v32, %s1886_s13 }
  0x4f   : > { %1788 = vset.pattern.permute.xlu1 %v1885_v5 }
  0x50   : > { %633 = vperm.xlu1 %1788, %v1996_v6  }
  0x52   : > { %558 = vperm.xlu0 %1790, %v2092_v33  }
  0x54   : > { %1789 = vset.pattern.permute.xlu1 %v1883_v0 }
  0x55   : > { %742 = vperm.xlu1 %1789, %v2058_v23  }
  0x56   : > { %366 = vrot.lane.b32.xlu0 %v2075_v29, %s1887_s14 }
  0x59   : > { %1791 = vset.pattern.permute.xlu1 %v1884_v1 }
  0x5a   : > { %540 = vperm.xlu1 %1791, %v2105_v36   ;;  %430 = vrot.lane.b32.xlu0 %v323_v37, %s1886_s13  ;;  %v2250_v37 = vld [vmem:[%s1990_s12 + $0x68] sm:$0xff] }
  0x5e   : > { %1792 = vset.pattern.permute.xlu1 %v1885_v5  ;;  %432 = vrot.lane.b32.xlu0 %v335_v38, %s1886_s13  ;;  %v2255_v38 = vld [vmem:[%s1990_s12 + $0x60] sm:$0xff] }
  0x5f   : > { %636 = vperm.xlu1 %1792, %v2105_v36   ;;  %v308_v41 = vrot.slane %v2255_v38, 1 }
  0x62   : > { %564 = vperm.xlu0 %1790, %v2118_v39  }
  0x63   : > { %354 = vrot.lane.b32.xlu1 %v2002_v8, %s1887_s14 }
  0x64   : > { %1793 = vset.pattern.permute.xlu1 %v1884_v1 }
  0x66   : > { %1811 = vset.pattern.permute.xlu0 %v1885_v5 }
  0x67   : > { %543 = vperm.xlu1 %1793, %v2125_v40   ;;  %618 = vperm.xlu0 %1811, %v1999_v7  }
  0x6b   : > { %1794 = vset.pattern.permute.xlu1 %v1888_v46  ;;  %639 = vperm.xlu0 %1811, %v2125_v40  }
  0x6c   : > { %857 = vperm.xlu1 %1794, %v1996_v6   ;;  %v1692_v6 = vpack.c.bf16 %v962_v63, %v961_v62 }
  0x6e   : > { %1693 = vmatprep.subr.bf16.mxu1 %v1692_v6 }
  0x6f   : > { %645 = vperm.xlu0 %1811, %v2146_v48   ;;  %1695 = vmatpush3.bf16.msra.mxu1 %v1692_v6 }
  0x70   : > { %356 = vrot.lane.b32.xlu1 %v2005_v9, %s1887_s14  ;;  %1697 = vmatprep.subr.bf16.mxu1 %v1696_v16 }
  0x71   : > { %1795 = vset.pattern.permute.xlu1 %v1883_v0 }
  0x73   : > { %651 = vperm.xlu0 %1811, %v2161_v53   ;;  %1699 = vmatpush3.bf16.msra.mxu1 %v1696_v16  ;;  %v337_v16 = vsel %vm321_vm0, %v320_v52, %v308_v41 }
  0x74   : > { %748 = vperm.xlu1 %1795, %v2105_v36   ;;  %1701 = vmatprep.subr.bf16.mxu1 %v1700_v21 }
  0x77   : > { %657 = vperm.xlu0 %1811, %v2173_v57   ;;  %1703 = vmatpush3.bf16.msra.mxu1 %v1700_v21 }
  0x78   : > { %751 = vperm.xlu1 %1795, %v2125_v40   ;;  %1705 = vmatprep.subr.bf16.mxu1 %v1704_v28 }
  0x7b   : > { %370 = vrot.lane.b32.xlu0 %v2184_v61, %s1887_s14  ;;  %1707 = vmatpush3.bf16.msra.mxu1 %v1704_v28  ;;  %v283_v28 = vrot.slane %v2096_v34, 7 }
  0x7c   : > { %1796 = vset.pattern.permute.xlu1 %v1885_v5 }
  0x7d   : > { %642 = vperm.xlu1 %1796, %v2036_v18  }
  0x7f   : > { %663 = vperm.xlu0 %1811, %v2196_v11  }
  0x81   : > { %1797 = vset.pattern.permute.xlu1 %v1888_v46 }
  0x82   : > { %860 = vperm.xlu1 %1797, %v2105_v36   ;;  %v307_v36 = vrot.slane %v2184_v61, 1 }
  0x83   : > { %1815 = vset.pattern.permute.xlu0 %v1888_v46 }
  0x84   : > { %842 = vperm.xlu0 %1815, %v1999_v7   ;;  %v2227_v7 = vld [vmem:[%s1990_s12 + $0x50] sm:$0xff]  ;;  %s236_s12 = sand.u32 1, %s1873_s19  }
  0x85   : > { %v315_v32 = vrot.slane %v2227_v7, 1  ;;  %s2815_s22 = scalar_lea.sflag [#allocation3], %s236_s12 }
  0x86   : > { %1798 = vset.pattern.permute.xlu1 %v1884_v1 }
  0x87   : > { %549 = vperm.xlu1 %1798, %v2146_v48  }
  0x88   : > { %845 = vperm.xlu0 %1815, %v1980_v2   ;;  %v319_v2 = vrot.slane %v2230_v30, 1 }
  0x8a   : > { %v2244_v35 = vsel %vm321_vm0, %v315_v32, %v319_v2  ;;  %v336_v59 = vsel %vm321_vm0, %v319_v2, %v307_v36 }
  0x8b   : > { %1799 = vset.pattern.permute.xlu1 %v1888_v46 }
  0x8c   : > { %863 = vperm.xlu1 %1799, %v2125_v40   ;;  %848 = vperm.xlu0 %1815, %v2021_v14   ;;  %v311_v14 = vrot.slane %v2235_v31, 1  ;;  %v312_v40 = vrot.slane %v2250_v37, 1 }
  0x8e   : > { %v328_v44 = vsel %vm321_vm0, %v311_v14, %v315_v32  ;;  %v329_v6 = vsel %vm321_vm0, %v312_v40, %v316_v51 }
  0x90   : > { %360 = vrot.lane.b32.xlu1 %v2039_v19, %s1887_s14  ;;  %851 = vperm.xlu0 %1815, %v1985_v3   ;;  %v332_v3 = vsel %vm321_vm0, %v307_v36, %v311_v14  ;;  %v2355_v36 = vand.u32 127, %v286_v4  ;;  %v302_v14 = vsel %vm288_vm2, %v283_v28, %v2862_v27 }
  0x91   : > { %1800 = vset.pattern.permute.xlu1 %v1883_v0 }
  0x94   : > { %754 = vperm.xlu1 %1800, %v2036_v18   ;;  %854 = vperm.xlu0 %1815, %v2058_v23   ;;  %v2269_v23 = vsel %vm321_vm0, %v308_v41, %v312_v40  ;;  %v2866_v41 = vmov 0.0  }
  0x98   : > { %v2261_v42 = vpop.permute.xlu1 %525  ;;  %757 = vperm.xlu1 %1800, %v2146_v48   ;;  %v2264_v43 = vpop.permute.xlu0 %733  ;;  %434 = vrot.lane.b32.xlu0 %v332_v3, %s1886_s13 }
  0x99   : > { %vm570_vm14 = vcmp.eq.s32.totalorder %v2355_v36, %v2261_v42  ;;  %vm778_vm0 = vcmp.eq.s32.totalorder %v2355_v36, %v2264_v43 }
  0x9c   : > { %1801 = vset.pattern.permute.xlu1 %v1885_v5  ;;  %v2280_v49 = vpop.permute.xlu0 %739  ;;  %436 = vrot.lane.b32.xlu0 %v328_v44, %s1886_s13 }
  0x9d   : > { %v2283_v50 = vpop.permute.xlu1 %621  ;;  %648 = vperm.xlu1 %1801, %v2061_v24  }
  0x9e   : > { %vm666_vm13 = vcmp.eq.s32.totalorder %v2355_v36, %v2283_v50 }
  0xa0   : > { %v2292_v55 = vpop.permute.xlu0 %745  ;;  %884 = vperm.xlu0 %1815, %v2118_v39  }
  0xa1   : > { %1802 = vset.pattern.permute.xlu1 %v1888_v46  ;;  %vm782_vm7 = vcmp.eq.s32.totalorder %v2355_v36, %v2292_v55 }
  0xa2   : > { %v2296_v56 = vpop.permute.xlu1 %730  ;;  %866 = vperm.xlu1 %1802, %v2036_v18  }
  0xa3   : > { %vm777_vm15 = vcmp.eq.s32.totalorder %v2355_v36, %v2296_v56 }
  0xa4   : > { %376 = vrot.lane.b32.xlu0 %v2230_v30, %s1887_s14 }
  0xa5   : > { %v2301_v58 = vpop.permute.xlu0 %522 }
  0xa6   : > { %1803 = vset.pattern.permute.xlu1 %v1884_v1  ;;  %vm569_vm11 = vcmp.eq.s32.totalorder %v2355_v36, %v2301_v58 }
  0xa7   : > { %v2306_v60 = vpop.permute.xlu1 %528  ;;  %555 = vperm.xlu1 %1803, %v2161_v53  }
  0xa8   : > { %440 = vrot.lane.b32.xlu0 %v336_v59, %s1886_s13 }
  0xa9   : > { %v2310_v62 = vpop.permute.xlu0 %418 }
  0xab   : > { %1804 = vset.pattern.permute.xlu1 %v1888_v46 }
  0xac   : > { %v2313_v18 = vpop.permute.xlu1 %624  ;;  %869 = vperm.xlu1 %1804, %v2146_v48   ;;  %380 = vrot.lane.b32.xlu0 %v2250_v37, %s1887_s14 }
  0xad   : > { %v2318_v63 = vpop.permute.xlu0 %420  ;;  %vm667_vm1 = vcmp.eq.s32.totalorder %v2355_v36, %v2313_v18 }
  0xb0   : > { %364 = vrot.lane.b32.xlu1 %v2068_v26, %s1887_s14  ;;  %444 = vrot.lane.b32.xlu0 %v329_v6, %s1886_s13 }
  0xb1   : > { %v2325_v12 = vpop.permute.xlu1 %531  ;;  %v2327_v15 = vpop.permute.xlu0 %546  ;;  %1805 = vset.pattern.permute.xlu1 %v1883_v0 }
  0xb4   : > { %760 = vperm.xlu1 %1805, %v2061_v24   ;;  %384 = vrot.lane.b32.xlu0 %v2277_v47, %s1887_s14 }
  0xb5   : > { %v2333_v48 = vpop.permute.xlu0 %358 }
  0xb6   : > { %v2337_v17 = vpop.permute.xlu1 %627 }
  0xb8   : > { %763 = vperm.xlu1 %1805, %v2161_v53   ;;  %448 = vrot.lane.b32.xlu0 %v337_v16, %s1886_s13  ;;  %v279_v16 = vrot.slane %v2075_v29, 7  ;;  %v1485_v29 = vsel %vm782_vm7, 1.0, %v2866_v41  ;;  %vm571_vm7 = vcmp.eq.s32.totalorder %v2355_v36, %v2306_v60 }
  0xb9   : > { %v2341_v20 = vpop.permute.xlu0 %422 }
  0xbb   : > { %v2343_v21 = vpop.permute.xlu1 %736 }
  0xbc   : > { %1806 = vset.pattern.permute.xlu1 %v1885_v5 }
  0xbd   : > { %654 = vperm.xlu1 %1806, %v2092_v33   ;;  %v2347_v22 = vpop.permute.xlu0 %424 }
  0xc0   : > { %v535_v32 = vpop.permute.xlu1 %534 }
  0xc1   : > { %1807 = vset.pattern.permute.xlu1 %v1888_v46  ;;  %v2352_v2 = vpop.permute.xlu0 %552  ;;  %vm573_vm3 = vcmp.eq.s32.totalorder %v2355_v36, %v535_v32 }
  0xc2   : > { %872 = vperm.xlu1 %1807, %v2061_v24   ;;  %v1452_v44 = vsel %vm573_vm3, 1.0, %v2866_v41 }
  0xc5   : > { %v631_v3 = vpop.permute.xlu1 %630  ;;  %v363_v40 = vpop.permute.xlu0 %362 }
  0xc6   : > { %vm669_vm5 = vcmp.eq.s32.totalorder %v2355_v36, %v631_v3  ;;  %1808 = vset.pattern.permute.xlu1 %v1884_v1  ;;  %v471_v4 = vsel %vm466_vm4, %v302_v14, %v363_v40  ;;  %v2385_v14 = vsel %vm288_vm2, %v279_v16, %v283_v28  ;;  %v2863_v40 = vrot.slane %v2068_v26, 7 }
  0xc7   : > { %v1468_v24 = vsel %vm669_vm5, 1.0, %v2866_v41  ;;  %561 = vperm.xlu1 %1808, %v2173_v57   ;;  %vm668_vm5 = vcmp.eq.s32.totalorder %v2355_v36, %v2337_v17 }
  0xc8   : > { %v2370_v51 = vadd.f32 %v1468_v24, %v1452_v44  ;;  %v294_v44 = vsel %vm288_vm2, %v2863_v40, %v279_v16  ;;  %v2864_v16 = vrot.slane %v2039_v19, 7 }
  0xc9   : > { %v427_v52 = vpop.permute.xlu0 %426 }
  0xca   : > { %v538_v59 = vpop.permute.xlu1 %537  ;;  %v2373_v6 = vsel %vm483_vm6, %v471_v4, %v427_v52 }
  0xcb   : > { %1809 = vset.pattern.permute.xlu1 %v1888_v46  ;;  %vm574_vm8 = vcmp.eq.s32.totalorder %v2355_v36, %v538_v59 }
  0xcc   : > { %875 = vperm.xlu1 %1809, %v2161_v53   ;;  %v1453_v53 = vsel %vm574_vm8, 1.0, %v2866_v41  ;;  %vm779_vm8 = vcmp.eq.s32.totalorder %v2355_v36, %v2343_v21 }
  0xcd   : > { %v2378_v32 = vpop.permute.xlu0 %428 }
  0xcf   : > { %v634_v3 = vpop.permute.xlu1 %633 }
  0xd0   : > { %vm670_vm9 = vcmp.eq.s32.totalorder %v2355_v36, %v634_v3  ;;  %368 = vrot.lane.b32.xlu1 %v2096_v34, %s1887_s14 }
  0xd1   : > { %v1469_v55 = vsel %vm670_vm9, 1.0, %v2866_v41  ;;  %v2394_v4 = vpop.permute.xlu0 %558  ;;  %1810 = vset.pattern.permute.xlu1 %v1883_v0  ;;  %vm572_vm9 = vcmp.eq.s32.totalorder %v2355_v36, %v2325_v12 }
  0xd2   : > { %v718_v28 = vadd.f32 %v1469_v55, %v1453_v53  ;;  %v270_v55 = vrot.slane %v2002_v8, 7 }
  0xd4   : > { %v2401_v24 = vpop.permute.xlu1 %742  ;;  %766 = vperm.xlu1 %1810, %v2092_v33   ;;  %v2404_v34 = vadd.f32 %v1485_v29, %v718_v28 }
  0xd5   : > { %v367_v52 = vpop.permute.xlu0 %366 }
  0xd6   : > { %v473_v59 = vsel %vm466_vm4, %v294_v44, %v367_v52  ;;  %v301_v44 = vsel %vm288_vm2, %v2864_v16, %v270_v55 }
  0xd8   : > { %769 = vperm.xlu1 %1810, %v2173_v57  }
  0xd9   : > { %v2408_v3 = vpop.permute.xlu1 %540  ;;  %v431_v27 = vpop.permute.xlu0 %430 }
  0xda   : > { %v2411_v53 = vsel %vm483_vm6, %v473_v59, %v431_v27  ;;  %v2865_v59 = vrot.slane %v2017_v13, 7 }
  0xdc   : > { %1812 = vset.pattern.permute.xlu1 %v1885_v5 }
  0xdd   : > { %660 = vperm.xlu1 %1812, %v2118_v39   ;;  %v2417_v29 = vpop.permute.xlu0 %432 }
  0xde   : > { %v2419_v28 = vpop.permute.xlu1 %636 }
  0xe1   : > { %1813 = vset.pattern.permute.xlu1 %v1888_v46  ;;  %v2426_v27 = vpop.permute.xlu0 %564 }
  0xe2   : > { %878 = vperm.xlu1 %1813, %v2092_v33   ;;  %v355_v5 = vpop.permute.xlu1 %354  ;;  %v274_v33 = vrot.slane %v2005_v9, 7 }
  0xe3   : > { %v467_v8 = vsel %vm466_vm4, %v301_v44, %v355_v5 }
  0xe4   : > { %v484_v52 = vsel %vm483_vm6, %v467_v8, %v2310_v62  ;;  %v293_v44 = vsel %vm288_vm2, %v274_v33, %v2865_v59  ;;  %v297_v8 = vsel %vm288_vm2, %v270_v55, %v274_v33  ;;  %v2868_v33 = vrot.slane %v2230_v30, 7 }
  0xe5   : > { %1652 = vmatprep.mubr.msk.f32.mxu0 %vm1114_vm10, %v484_v52 }
  0xe6   : > { %1814 = vset.pattern.permute.xlu1 %v1884_v1  ;;  %v2435_v40 = vpop.permute.xlu1 %543  ;;  %v619_v16 = vpop.permute.xlu0 %618  ;;  %v469_v1 = vsel %vm466_vm4, %v293_v44, %v2333_v48 }
  0xe7   : > { %567 = vperm.xlu1 %1814, %v2196_v11   ;;  %v486_v59 = vsel %vm483_vm6, %v469_v1, %v2341_v20  ;;  %v272_v20 = vrot.slane %v2184_v61, 7  ;;  %vm665_vm12 = vcmp.eq.s32.totalorder %v2355_v36, %v619_v16 }
  0xea   : > { %v2443_v5 = vpop.permute.xlu0 %639 }
  0xeb   : > { %1816 = vset.pattern.permute.xlu1 %v1888_v46  ;;  %v2446_v62 = vpop.permute.xlu1 %857 }
  0xec   : > { %881 = vperm.xlu1 %1816, %v2173_v57  }
  0xee   : > { %v2453_v9 = vpop.permute.xlu0 %645 }
  0xef   : > { %v357_v52 = vpop.permute.xlu1 %356 }
  0xf0   : > { %v468_v41 = vsel %vm466_vm4, %v297_v8, %v357_v52  ;;  %372 = vrot.lane.b32.xlu1 %v2235_v31, %s1887_s14 }
  0xf1   : > { %v485_v57 = vsel %vm483_vm6, %v468_v41, %v2318_v63  ;;  %1817 = vset.pattern.permute.xlu1 %v1883_v0  ;;  %v303_v0 = vsel %vm288_vm2, %v2868_v33, %v272_v20 }
  0xf2   : > { %1653 = vmatmul.mubr.msk.f32.vlgmr.msra.gmra.mrb[0].mxu0 %vm1114_vm10, %v485_v57  ;;  %v2464_v48 = vpop.permute.xlu0 %651 }
  0xf3   : > { %v2466_v55 = vpop.permute.xlu1 %748  ;;  %1655 = vmatprep.mubr.msk.f32.mxu0 %vm1114_vm10, %v486_v59  ;;  %v2871_v59 = vmov 0.0  }
  0xf4   : > { %772 = vperm.xlu1 %1817, %v2118_v39   ;;  %v1448_v8 = vsel %vm569_vm11, 1.0, %v2871_v59  ;;  %v1464_v52 = vsel %vm665_vm12, 1.0, %v2871_v59  ;;  %v1465_v57 = vsel %vm666_vm13, 1.0, %v2871_v59  ;;  %v1480_v50 = vsel %vm777_vm15, 1.0, %v2871_v59 }
  0xf5   : > { %v713_v16 = vadd.f32 %v1464_v52, %v1448_v8  ;;  %v1466_v8 = vsel %vm667_vm1, 1.0, %v2871_v59  ;;  %v1467_v52 = vsel %vm668_vm5, 1.0, %v2871_v59  ;;  %vm780_vm12 = vcmp.eq.s32.totalorder %v2355_v36, %v2280_v49 }
  0xf6   : > { %v2472_v44 = vpop.permute.xlu0 %657  ;;  %v1450_v60 = vsel %vm571_vm7, 1.0, %v2871_v59  ;;  %v1482_v21 = vsel %vm779_vm8, 1.0, %v2871_v59  ;;  %vm781_vm13 = vcmp.eq.s32.totalorder %v2355_v36, %v2401_v24  ;;  %vm671_vm15 = vcmp.eq.s32.totalorder %v2355_v36, %v2419_v28 }
  0xf7   : > { %v2474_v1 = vpop.permute.xlu1 %751  ;;  %v825_v42 = vadd.f32 %v1480_v50, %v713_v16  ;;  %v715_v12 = vadd.f32 %v1466_v8, %v1450_v60  ;;  %v1484_v24 = vsel %vm781_vm13, 1.0, %v2871_v59  ;;  %v1470_v28 = vsel %vm671_vm15, 1.0, %v2871_v59 }
  0xf8   : > { %775 = vperm.xlu1 %1817, %v2196_v11   ;;  %vm783_vm1 = vcmp.eq.s32.totalorder %v2355_v36, %v2466_v55  ;;  %vm672_vm5 = vcmp.eq.s32.totalorder %v2355_v36, %v2443_v5  ;;  %vm894_vm7 = vcmp.eq.s32.totalorder %v2355_v36, %v2446_v62  ;;  %v829_v55 = vadd.f32 %v1484_v24, %v2370_v51 }
  0xfa   : > { %v371_v39 = vpop.permute.xlu0 %370 }
  0xfb   : > { %v2487_v63 = vsel %vm466_vm4, %v303_v0, %v371_v39 }
  0xfc   : > { %374 = vrot.lane.b32.xlu1 %v2227_v7, %s1887_s14  ;;  %v2491_v41 = vpop.permute.xlu1 %642 }
  0xfd   : > { %1818 = vset.pattern.permute.xlu1 %v1888_v46  ;;  %v1449_v46 = vsel %vm570_vm14, 1.0, %v2871_v59  ;;  %vm673_vm15 = vcmp.eq.s32.totalorder %v2355_v36, %v2491_v41 }
  0xfe   : > { %v2498_v58 = vpop.permute.xlu0 %663  ;;  %v714_v33 = vadd.f32 %v1465_v57, %v1449_v46  ;;  %v1451_v57 = vsel %vm572_vm9, 1.0, %v2871_v59  ;;  %vm576_vm9 = vcmp.eq.s32.totalorder %v2355_v36, %v2435_v40  ;;  %v1501_v40 = vsel %vm894_vm7, 1.0, %v2871_v59 }
 0x100   : > { %887 = vperm.xlu1 %1818, %v2196_v11   ;;  %v1481_v11 = vsel %vm778_vm0, 1.0, %v2871_v59  ;;  %vm575_vm0 = vcmp.eq.s32.totalorder %v2355_v36, %v2408_v3  ;;  %v1471_v3 = vsel %vm672_vm5, 1.0, %v2871_v59 }
 0x101   : > { %v2506_v0 = vpop.permute.xlu1 %860  ;;  %v826_v17 = vadd.f32 %v1481_v11, %v714_v33  ;;  %v716_v33 = vadd.f32 %v1467_v52, %v1451_v57  ;;  %v827_v11 = vadd.f32 %v1482_v21, %v715_v12  ;;  %v1486_v12 = vsel %vm783_vm1, 1.0, %v2871_v59 }
 0x102   : > { %vm895_vm8 = vcmp.eq.s32.totalorder %v2355_v36, %v2506_v0 }
 0x103   : > { %v843_v39 = vpop.permute.xlu0 %842 }
 0x104   : > { %vm889_vm3 = vcmp.eq.s32.totalorder %v2355_v36, %v843_v39  ;;  %438 = vrot.lane.b32.xlu1 %v2244_v35, %s1886_s13 }
 0x105   : > { %v1496_v43 = vsel %vm889_vm3, 1.0, %v2871_v59 }
 0x106   : > { %v2525_v56 = vpop.permute.xlu1 %549  ;;  %v937_v18 = vadd.f32 %v1496_v43, %v825_v42  ;;  %v1483_v42 = vsel %vm780_vm12, 1.0, %v2871_v59  ;;  %v2872_v43 = vrot.slane %v2039_v19, 7 }
 0x107   : > { %v846_v35 = vpop.permute.xlu0 %845  ;;  %vm578_vm5 = vcmp.eq.s32.totalorder %v2355_v36, %v2525_v56  ;;  %v2874_v56 = vrot.slane %v2068_v26, 7 }
 0x108   : > { %vm890_vm11 = vcmp.eq.s32.totalorder %v2355_v36, %v846_v35  ;;  %1622 = vmatprep.mubr.f32.mxu1 %v937_v18  ;;  %378 = vrot.lane.b32.xlu1 %v2255_v38, %s1887_s14  ;;  %v2873_v18 = vrot.slane %v2017_v13, 7 }
 0x109   : > { %v1497_v16 = vsel %vm890_vm11, 1.0, %v2871_v59  ;;  %vm784_vm11 = vcmp.eq.s32.totalorder %v2355_v36, %v2474_v1  ;;  %v1455_v1 = vsel %vm576_vm9, 1.0, %v2871_v59 }
 0x10a   : > { %v938_v46 = vadd.f32 %v1497_v16, %v826_v17  ;;  %v289_v8 = vsel %vm288_vm2, %v2873_v18, %v2872_v43  ;;  %v1454_v16 = vsel %vm575_vm0, 1.0, %v2871_v59  ;;  %v1487_v62 = vsel %vm784_vm11, 1.0, %v2871_v59 }
 0x10b   : > { %v864_v50 = vpop.permute.xlu1 %863  ;;  %v849_v39 = vpop.permute.xlu0 %848  ;;  %v719_v57 = vadd.f32 %v1470_v28, %v1454_v16  ;;  %v1472_v18 = vsel %vm673_vm15, 1.0, %v2871_v59  ;;  %v1457_v28 = vsel %vm578_vm5, 1.0, %v2871_v59  ;;  %vm579_vm11 = vcmp.eq.s32.totalorder %v2355_v36, %v2352_v2 }
 0x10c   : > { %vm891_vm14 = vcmp.eq.s32.totalorder %v2355_v36, %v849_v39  ;;  %1623 = vmatmul.mubr.f32.vlgmr.msra.gmra.mrb[0].mxu1 %v938_v46  ;;  %442 = vrot.lane.b32.xlu1 %v2269_v23, %s1886_s13  ;;  %v828_v23 = vadd.f32 %v1483_v42, %v716_v33  ;;  %vm896_vm13 = vcmp.eq.s32.totalorder %v2355_v36, %v864_v50 }
 0x10d   : > { %v1498_v49 = vsel %vm891_vm14, 1.0, %v2871_v59  ;;  %v831_v46 = vadd.f32 %v1486_v12, %v719_v57  ;;  %v720_v39 = vadd.f32 %v1471_v3, %v1455_v1  ;;  %v942_v42 = vadd.f32 %v1501_v40, %v2404_v34 }
 0x10e   : > { %v939_v35 = vadd.f32 %v1498_v49, %v827_v11  ;;  %v1503_v49 = vsel %vm896_vm13, 1.0, %v2871_v59  ;;  %vm577_vm14 = vcmp.eq.s32.totalorder %v2355_v36, %v2327_v15  ;;  %vm581_vm5 = vcmp.eq.s32.totalorder %v2355_v36, %v2394_v4 }
 0x10f   : > { %v361_v52 = vpop.permute.xlu1 %360  ;;  %v852_v17 = vpop.permute.xlu0 %851  ;;  %v832_v0 = vadd.f32 %v1487_v62, %v720_v39  ;;  %v1456_v34 = vsel %vm577_vm14, 1.0, %v2871_v59  ;;  %vm676_vm14 = vcmp.eq.s32.totalorder %v2355_v36, %v2464_v48 }
 0x110   : > { %v470_v19 = vsel %vm466_vm4, %v289_v8, %v361_v52  ;;  %vm892_vm3 = vcmp.eq.s32.totalorder %v2355_v36, %v852_v17  ;;  %1625 = vmatprep.mubr.f32.mxu1 %v939_v35  ;;  %382 = vrot.lane.b32.xlu1 %v2274_v45, %s1887_s14  ;;  %v721_v35 = vadd.f32 %v1472_v18, %v1456_v34  ;;  %s1890_s14 = smov [#allocation2]  }
 0x111   : > { %v1499_v13 = vsel %vm892_vm3, 1.0, %v2871_v59  ;;  %v487_v60 = vsel %vm483_vm6, %v470_v19, %v2347_v22  ;;  %v944_v50 = vadd.f32 %v1503_v49, %v832_v0  ;;  %vm674_vm3 = vcmp.eq.s32.totalorder %v2355_v36, %v2453_v9  ;;  %s1823_s16 = sshll.u32 %s1890_s14, 4  ;;  %s1824_s16 = int_to_ptr.vmem [resolvable:$false] %s1823_s16 }
 0x112   : > { %v940_v21 = vadd.f32 %v1499_v13, %v828_v23  ;;  %1656 = vmatmul.mubr.msk.f32.gmra.mrb[2].mxu0 %vm1114_vm10, %v487_v60  ;;  %v1473_v17 = vsel %vm674_vm3, 1.0, %v2871_v59  ;;  %s1825_s17 = scalar_lea.vmem %s1824_s16, 4096 }
 0x113   : > { %v755_v22 = vpop.permute.xlu1 %754  ;;  %v855_v51 = vpop.permute.xlu0 %854  ;;  %1658 = vmatprep.mubr.msk.f32.mxu0 %vm1114_vm10, %v2373_v6  ;;  %v1502_v6 = vsel %vm895_vm8, 1.0, %v2871_v59  ;;  %v722_v13 = vadd.f32 %v1473_v17, %v1457_v28 }
 0x114   : > { %vm893_vm12 = vcmp.eq.s32.totalorder %v2355_v36, %v855_v51  ;;  %1626 = vmatmul.mubr.f32.gmra.mrb[2].mxu1 %v940_v21  ;;  %446 = vrot.lane.b32.xlu1 %v2290_v54, %s1886_s13  ;;  %v943_v54 = vadd.f32 %v1502_v6, %v831_v46  ;;  %vm785_vm0 = vcmp.eq.s32.totalorder %v2355_v36, %v755_v22  ;;  %v2875_v21 = vrot.slane %v2065_v25, 7  ;;  %s1441_s13 = sshll.u32 %s236_s12, 7 }
 0x115   : > { %v1500_v5 = vsel %vm893_vm12, 1.0, %v2871_v59  ;;  %v1488_v8 = vsel %vm785_vm0, 1.0, %v2871_v59  ;;  %v1458_v6 = vsel %vm579_vm11, 1.0, %v2871_v59  ;;  %vm678_vm11 = vcmp.eq.s32.totalorder %v2355_v36, %v2472_v44  ;;  %s2762_s25 = scalar_lea.vmem [#allocation2], %s1441_s13 }
 0x116   : > { %v941_v33 = vadd.f32 %v1500_v5, %v829_v55  ;;  %v833_v52 = vadd.f32 %v1488_v8, %v721_v35  ;;  %v298_v16 = vsel %vm288_vm2, %v2875_v21, %v2874_v56  ;;  %s1363_s8 = sshll.u32 %s2762_s25, 4  ;;  %s2808_s8 = int_to_ptr.vmem [resolvable:$true] %s1363_s8 }
 0x117   : > { %v758_v11 = vpop.permute.xlu1 %757  ;;  %s1819_s13 = scalar_lea.vmem %s2808_s8, 2048  ;;  %p1826_p0 = scmp.lt.s32.totalorder %s2808_s8, %s1824_s16 }
 0x118   : > { %1628 = vmatprep.mubr.f32.mxu1 %v941_v33  ;;  %vm786_vm7 = vcmp.eq.s32.totalorder %v2355_v36, %v758_v11  ;;  %v1475_v33 = vsel %vm676_vm14, 1.0, %v2871_v59  ;;  %p1820_p11 = scmp.ne.s32.totalorder %s2808_s8, %s1819_s13  ;;  %p1827_p1 = scmp.lt.s32.totalorder %s1825_s17, %s1819_s13 }
 0x119   : > { %1629 = vmatmul.mubr.f32.gmra.mrb[4].mxu1 %v942_v42  ;;  %v1489_v19 = vsel %vm786_vm7, 1.0, %v2871_v59 }
 0x11a   : > { %1631 = vmatprep.mubr.f32.mxu1 %v943_v54  ;;  %v834_v55 = vadd.f32 %v1489_v19, %v722_v13  ;;  %v1477_v13 = vsel %vm678_vm11, 1.0, %v2871_v59  ;;  %p1821_p12 = pnand %p1820_p11, %p1961_p5  ;;  %p1828_p2 = por %p1827_p1, %p1826_p0 }
 0x11c   : > { %v649_v43 = vpop.permute.xlu1 %648  ;;  %p1822_p13 = pneg %p1821_p12 }
 0x11d   : > { %1632 = vmatmul.mubr.f32.gmra.mrb[6].mxu1 %v944_v50  ;;  %vm675_vm9 = vcmp.eq.s32.totalorder %v2355_v36, %v649_v43  ;;  %v435_v50 = vpop.permute.xlu0 %434 }
 0x11e   : > { %v1474_v40 = vsel %vm675_vm9, 1.0, %v2871_v59  ;;  %v492_v8 = vsel %vm483_vm6, %v2487_v63, %v435_v50  ;;  %p1829_p3 = pnand %p1828_p2, %p1822_p13 }
 0x11f   : > { %v723_v5 = vadd.f32 %v1474_v40, %v1458_v6 }
 0x121   : > { %v867_v24 = vpop.permute.xlu1 %866  ;;  %v437_v56 = vpop.permute.xlu0 %436 }
 0x122   : > { %vm897_vm1 = vcmp.eq.s32.totalorder %v2355_v36, %v867_v24 }
 0x123   : > { %v1504_v15 = vsel %vm897_vm1, 1.0, %v2871_v59 }
 0x124   : > { %v945_v41 = vadd.f32 %v1504_v15, %v833_v52 }
 0x126   : > { %v556_v23 = vpop.permute.xlu1 %555  ;;  %1634 = vmatprep.mubr.f32.mxu1 %v945_v41 }
 0x127   : > { %vm580_vm15 = vcmp.eq.s32.totalorder %v2355_v36, %v556_v23 }
 0x128   : > { %v1459_v39 = vsel %vm580_vm15, 1.0, %v2871_v59  ;;  %vm583_vm15 = vcmp.eq.s32.totalorder %v2355_v36, %v2426_v27 }
 0x129   : > { %v724_v11 = vadd.f32 %v1475_v33, %v1459_v39  ;;  %v1462_v61 = vsel %vm583_vm15, 1.0, %v2871_v59 }
 0x12b   : > { %v870_v60 = vpop.permute.xlu1 %869 }
 0x12c   : > { %vm898_vm8 = vcmp.eq.s32.totalorder %v2355_v36, %v870_v60 }
 0x12d   : > { %v1505_v9 = vsel %vm898_vm8, 1.0, %v2871_v59 }
 0x12e   : > { %v946_v12 = vadd.f32 %v1505_v9, %v834_v55  ;;  %v276_v55 = vrot.slane %v2235_v31, 7  ;;  %v885_v31 = vpop.permute.xlu0 %884 }
 0x12f   : > { %v365_v22 = vpop.permute.xlu1 %364 }
 0x130   : > { %v472_v51 = vsel %vm466_vm4, %v298_v16, %v365_v22  ;;  %1635 = vmatmul.mubr.f32.gmra.mrb[8].mxu1 %v946_v12  ;;  %v299_v12 = vsel %vm288_vm2, %v272_v20, %v276_v55 }
 0x131   : > { %v489_v57 = vsel %vm483_vm6, %v472_v51, %v2378_v32 }
 0x132   : > { %1659 = vmatmul.mubr.msk.f32.gmra.mrb[4].mxu0 %vm1114_vm10, %v489_v57  ;;  %v377_v40 = vpop.permute.xlu0 %376 }
 0x133   : > { %v761_v3 = vpop.permute.xlu1 %760  ;;  %1661 = vmatprep.mubr.msk.f32.mxu0 %vm1114_vm10, %v2411_v53 }
 0x134   : > { %vm787_vm12 = vcmp.eq.s32.totalorder %v2355_v36, %v761_v3 }
 0x135   : > { %v1490_v32 = vsel %vm787_vm12, 1.0, %v2871_v59 }
 0x136   : > { %v835_v46 = vadd.f32 %v1490_v32, %v723_v5 }
 0x137   : > { %v764_v26 = vpop.permute.xlu1 %763 }
 0x138   : > { %vm788_vm0 = vcmp.eq.s32.totalorder %v2355_v36, %v764_v26 }
 0x139   : > { %v1491_v42 = vsel %vm788_vm0, 1.0, %v2871_v59  ;;  %vm903_vm0 = vcmp.eq.s32.totalorder %v2355_v36, %v885_v31 }
 0x13a   : > { %v836_v49 = vadd.f32 %v1491_v42, %v724_v11  ;;  %v1510_v32 = vsel %vm903_vm0, 1.0, %v2871_v59  ;;  %v2876_v11 = vrot.slane %v2230_v30, 7  ;;  %v273_v30 = vrot.slane %v2255_v38, 7 }
 0x13c   : > { %v655_v25 = vpop.permute.xlu1 %654 }
 0x13d   : > { %vm677_vm3 = vcmp.eq.s32.totalorder %v2355_v36, %v655_v25 }
 0x13e   : > { %v1476_v52 = vsel %vm677_vm3, 1.0, %v2871_v59 }
 0x141   : > { %v873_v1 = vpop.permute.xlu1 %872 }
 0x142   : > { %vm899_vm13 = vcmp.eq.s32.totalorder %v2355_v36, %v873_v1 }
 0x143   : > { %v1506_v53 = vsel %vm899_vm13, 1.0, %v2871_v59 }
 0x144   : > { %v947_v2 = vadd.f32 %v1506_v53, %v835_v46  ;;  %v441_v46 = vpop.permute.xlu0 %440 }
 0x146   : > { %v562_v62 = vpop.permute.xlu1 %561  ;;  %1637 = vmatprep.mubr.f32.mxu1 %v947_v2 }
 0x147   : > { %vm582_vm9 = vcmp.eq.s32.totalorder %v2355_v36, %v562_v62  ;;  %v280_v62 = vrot.slane %v2227_v7, 7 }
 0x148   : > { %v1461_v19 = vsel %vm582_vm9, 1.0, %v2871_v59 }
 0x149   : > { %v726_v9 = vadd.f32 %v1477_v13, %v1461_v19 }
 0x14b   : > { %v876_v54 = vpop.permute.xlu1 %875 }
 0x14c   : > { %vm900_vm1 = vcmp.eq.s32.totalorder %v2355_v36, %v876_v54  ;;  %v291_v54 = vsel %vm288_vm2, %v280_v62, %v2876_v11 }
 0x14d   : > { %v1507_v48 = vsel %vm900_vm1, 1.0, %v2871_v59  ;;  %v478_v50 = vsel %vm466_vm4, %v291_v54, %v377_v40 }
 0x14e   : > { %v948_v0 = vadd.f32 %v1507_v48, %v836_v49  ;;  %v295_v48 = vsel %vm288_vm2, %v276_v55, %v280_v62 }
 0x14f   : > { %v369_v43 = vpop.permute.xlu1 %368 }
 0x150   : > { %v474_v34 = vsel %vm466_vm4, %v2385_v14, %v369_v43  ;;  %1638 = vmatmul.mubr.f32.gmra.mrb[10].mxu1 %v948_v0  ;;  %v381_v0 = vpop.permute.xlu0 %380 }
 0x151   : > { %v491_v18 = vsel %vm483_vm6, %v474_v34, %v2417_v29  ;;  %v1460_v29 = vsel %vm581_vm5, 1.0, %v2871_v59  ;;  %vm680_vm5 = vcmp.eq.s32.totalorder %v2355_v36, %v2498_v58  ;;  %v277_v34 = vrot.slane %v2250_v37, 7 }
 0x152   : > { %1662 = vmatmul.mubr.msk.f32.gmra.mrb[6].mxu0 %vm1114_vm10, %v491_v18  ;;  %v725_v15 = vadd.f32 %v1476_v52, %v1460_v29  ;;  %v1479_v33 = vsel %vm680_vm5, 1.0, %v2871_v59 }
 0x153   : > { %v767_v35 = vpop.permute.xlu1 %766  ;;  %1664 = vmatprep.mubr.msk.f32.mxu0 %vm1114_vm10, %v492_v8  ;;  %v300_v37 = vsel %vm288_vm2, %v273_v30, %v277_v34 }
 0x154   : > { %vm789_vm7 = vcmp.eq.s32.totalorder %v2355_v36, %v767_v35  ;;  %v285_v35 = vrot.slane %v2277_v47, 7  ;;  %v480_v52 = vsel %vm466_vm4, %v300_v37, %v381_v0 }
 0x155   : > { %v1492_v63 = vsel %vm789_vm7, 1.0, %v2871_v59 }
 0x156   : > { %v837_v23 = vadd.f32 %v1492_v63, %v725_v15  ;;  %v304_v38 = vsel %vm288_vm2, %v285_v35, %v273_v30  ;;  %v281_v63 = vrot.slane %v2274_v45, 7 }
 0x157   : > { %v770_v24 = vpop.permute.xlu1 %769 }
 0x158   : > { %vm790_vm12 = vcmp.eq.s32.totalorder %v2355_v36, %v770_v24 }
 0x159   : > { %v1493_v60 = vsel %vm790_vm12, 1.0, %v2871_v59 }
 0x15a   : > { %v838_v16 = vadd.f32 %v1493_v60, %v726_v9 }
 0x15c   : > { %v661_v14 = vpop.permute.xlu1 %660 }
 0x15d   : > { %vm679_vm14 = vcmp.eq.s32.totalorder %v2355_v36, %v661_v14 }
 0x15e   : > { %v1478_v3 = vsel %vm679_vm14, 1.0, %v2871_v59 }
 0x15f   : > { %v727_v25 = vadd.f32 %v1478_v3, %v1462_v61 }
 0x161   : > { %v879_v41 = vpop.permute.xlu1 %878 }
 0x162   : > { %vm901_vm8 = vcmp.eq.s32.totalorder %v2355_v36, %v879_v41 }
 0x163   : > { %v1508_v17 = vsel %vm901_vm8, 1.0, %v2871_v59 }
 0x164   : > { %v949_v28 = vadd.f32 %v1508_v17, %v837_v23  ;;  %v292_v17 = vsel %vm288_vm2, %v281_v63, %v285_v35 }
 0x166   : > { %v568_v4 = vpop.permute.xlu1 %567  ;;  %1640 = vmatprep.mubr.f32.mxu1 %v949_v28 }
 0x167   : > { %vm584_vm3 = vcmp.eq.s32.totalorder %v2355_v36, %v568_v4  ;;  %v296_v4 = vsel %vm288_vm2, %v277_v34, %v281_v63 }
 0x168   : > { %v1463_v53 = vsel %vm584_vm3, 1.0, %v2871_v59 }
 0x169   : > { %v728_v42 = vadd.f32 %v1479_v33, %v1463_v53 }
 0x16b   : > { %v882_v21 = vpop.permute.xlu1 %881 }
 0x16c   : > { %vm902_vm13 = vcmp.eq.s32.totalorder %v2355_v36, %v882_v21 }
 0x16d   : > { %v1509_v44 = vsel %vm902_vm13, 1.0, %v2871_v59 }
 0x16e   : > { %v950_v22 = vadd.f32 %v1509_v44, %v838_v16  ;;  %v2753_v16 = vld [vmem:[%s2858_s2 + $0x8] sm:$0xff] }
 0x16f   : > { %v373_v51 = vpop.permute.xlu1 %372 }
 0x170   : > { %v476_v57 = vsel %vm466_vm4, %v299_v12, %v373_v51  ;;  %1641 = vmatmul.mubr.f32.gmra.mrb[12].mxu1 %v950_v22  ;;  %v2758_v22 = vld [vmem:[%s2858_s2] sm:$0xff] }
 0x171   : > { %v493_v26 = vsel %vm483_vm6, %v476_v57, %v437_v56 }
 0x172   : > { %1665 = vmatmul.mubr.msk.f32.gmra.mrb[8].mxu0 %vm1114_vm10, %v493_v26 }
 0x173   : > { %v773_v20 = vpop.permute.xlu1 %772 }
 0x174   : > { %vm791_vm1 = vcmp.eq.s32.totalorder %v2355_v36, %v773_v20  ;;  %v2769_v20 = vld [vmem:[%s2858_s2 + $0x18] sm:$0xff] }
 0x175   : > { %v1494_v27 = vsel %vm791_vm1, 1.0, %v2871_v59 }
 0x176   : > { %v839_v6 = vadd.f32 %v1494_v27, %v727_v25  ;;  %v2774_v27 = vld [vmem:[%s2858_s2 + $0x10] sm:$0xff] }
 0x177   : > { %v776_v5 = vpop.permute.xlu1 %775 }
 0x178   : > { %v951_v1 = vadd.f32 %v1510_v32, %v839_v6  ;;  %vm792_vm7 = vcmp.eq.s32.totalorder %v2355_v36, %v776_v5 }
 0x179   : > { %v1495_v39 = vsel %vm792_vm7, 1.0, %v2871_v59 }
 0x17a   : > { %1643 = vmatprep.mubr.f32.mxu1 %v951_v1  ;;  %v840_v49 = vadd.f32 %v1495_v39, %v728_v42 }
 0x17b   : > { %v375_v2 = vpop.permute.xlu1 %374 }
 0x17c   : > { %v477_v18 = vsel %vm466_vm4, %v295_v48, %v375_v2 }
 0x17f   : > { %v888_v58 = vpop.permute.xlu1 %887 }
 0x180   : > { %vm904_vm8 = vcmp.eq.s32.totalorder %v2355_v36, %v888_v58  ;;  %v495_v36 = vsel %vm483_vm6, %v478_v50, %v441_v46 }
 0x181   : > { %v1511_v7 = vsel %vm904_vm8, 1.0, %v2871_v59  ;;  %v445_v59 = vpop.permute.xlu0 %444 }
 0x182   : > { %v952_v43 = vadd.f32 %v1511_v7, %v840_v49  ;;  %v497_v23 = vsel %vm483_vm6, %v480_v52, %v445_v59 }
 0x183   : > { %v439_v8 = vpop.permute.xlu1 %438 }
 0x184   : > { %v494_v24 = vsel %vm483_vm6, %v477_v18, %v439_v8  ;;  %1644 = vmatmul.mubr.f32.gmra.mrb[14].mxu1 %v952_v43 }
 0x185   : > { %1667 = vmatprep.mubr.msk.f32.mxu0 %vm1114_vm10, %v494_v24  ;;  %v385_v41 = vpop.permute.xlu0 %384 }
 0x186   : > { %1668 = vmatmul.mubr.msk.f32.gmra.mrb[10].mxu0 %vm1114_vm10, %v495_v36  ;;  %v482_v45 = vsel %vm466_vm4, %v292_v17, %v385_v41 }
 0x187   : > { %v379_v14 = vpop.permute.xlu1 %378 }
 0x188   : > { %v479_v47 = vsel %vm466_vm4, %v304_v38, %v379_v14 }
 0x189   : > { %v449_v19 = vpop.permute.xlu0 %448 }
 0x18a   : > { %v499_v9 = vsel %vm483_vm6, %v482_v45, %v449_v19 }
 0x18b   : > { %v443_v29 = vpop.permute.xlu1 %442 }
 0x18c   : > { %v496_v15 = vsel %vm483_vm6, %v479_v47, %v443_v29 }
 0x18d   : > { %1670 = vmatprep.mubr.msk.f32.mxu0 %vm1114_vm10, %v496_v15 }
 0x18e   : > { %1671 = vmatmul.mubr.msk.f32.gmra.mrb[12].mxu0 %vm1114_vm10, %v497_v23 }
 0x18f   : > { %v383_v28 = vpop.permute.xlu1 %382 }
 0x190   : > { %v481_v13 = vsel %vm466_vm4, %v296_v4, %v383_v28 }
 0x193   : > { %v447_v60 = vpop.permute.xlu1 %446 }
 0x194   : > { %v498_v55 = vsel %vm483_vm6, %v481_v13, %v447_v60 }
 0x195   : > { %1673 = vmatprep.mubr.msk.f32.mxu0 %vm1114_vm10, %v498_v55 }
 0x196   : > { %1674 = vmatmul.mubr.msk.f32.gmra.mrb[14].mxu0 %vm1114_vm10, %v499_v9 }
 0x1c5   : > { %v1654_v56 = vpop.f32.mrb[0].mxu0 }
 0x1c6   : > { %v1233_v21 = vpop.f32.mrb[1].mxu0 }
 0x1df   : > { %v1624_v10 = vpop.f32.mrb[0].mxu1 }
 0x1e0   : > { %v1239_v44 = vadd.f32 %v1654_v56, %v1624_v10  ;;  %v1035_v12 = vpop.f32.mrb[1].mxu1 }
 0x1e1   : > { %v1234_v51 = vadd.f32 %v1233_v21, %v1035_v12 }
 0x1e2   : > { %v1317_v31 = vadd.f32 %v2753_v16, %v1239_v44 }
 0x1e3   : > { %v1316_v57 = vadd.f32 %v2758_v22, %v1234_v51 }
 0x1e4   : > { %1333 = vst [vmem:[%s2762_s25 + $0x8] sm:$0xff] %v1317_v31 }
 0x1e5   : > { %1332 = vst [vmem:[%s2762_s25] sm:$0xff] %v1316_v57  ;;  %v1657_v3 = vpop.f32.mrb[2].mxu0 }
 0x1e6   : > { %v1243_v26 = vpop.f32.mrb[3].mxu0 }
 0x1e7   : > { %v1627_v61 = vpop.f32.mrb[2].mxu1 }
 0x1e8   : > { %v1249_v25 = vadd.f32 %v1657_v3, %v1627_v61  ;;  %v1045_v40 = vpop.f32.mrb[3].mxu1 }
 0x1e9   : > { %v1244_v6 = vadd.f32 %v1243_v26, %v1045_v40 }
 0x1ea   : > { %v1319_v32 = vadd.f32 %v2769_v20, %v1249_v25 }
 0x1eb   : > { %v1318_v5 = vadd.f32 %v2774_v27, %v1244_v6 }
 0x1ec   : > { %1335 = vst [vmem:[%s2762_s25 + $0x18] sm:$0xff] %v1319_v32  ;;  %v1630_v1 = vpop.f32.mrb[4].mxu1 }
 0x1ed   : > { %1334 = vst [vmem:[%s2762_s25 + $0x10] sm:$0xff] %v1318_v5  ;;  %v1055_v46 = vpop.f32.mrb[5].mxu1 }
 0x1f0   : > { %v1633_v53 = vpop.f32.mrb[6].mxu1 }
 0x1f1   : > { %v1065_v2 = vpop.f32.mrb[7].mxu1 }
 0x203   : > { %v1636_v62 = vpop.f32.mrb[8].mxu1 }
 0x204   : > { %v1075_v33 = vpop.f32.mrb[9].mxu1 }
 0x205   : > { %v1660_v39 = vpop.f32.mrb[4].mxu0 }
 0x206   : > { %v1259_v42 = vadd.f32 %v1660_v39, %v1630_v1  ;;  %v1253_v11 = vpop.f32.mrb[5].mxu0 }
 0x207   : > { %v1254_v54 = vadd.f32 %v1253_v11, %v1055_v46 }
 0x208   : > { %v1321_v58 = vadd.f32 %v2753_v16, %v1259_v42 }
 0x209   : > { %v1320_v49 = vadd.f32 %v2758_v22, %v1254_v54 }
 0x20a   : > { %1337 = vst [vmem:[%s2762_s25 + $0x28] sm:$0xff] %v1321_v58 }
 0x20b   : > { %1336 = vst [vmem:[%s2762_s25 + $0x20] sm:$0xff] %v1320_v49 }
 0x223   : > { %v1639_v48 = vpop.f32.mrb[10].mxu1 }
 0x224   : > { %v1085_v0 = vpop.f32.mrb[11].mxu1 }
 0x225   : > { %v1663_v7 = vpop.f32.mrb[6].mxu0 }
 0x226   : > { %v1269_v50 = vadd.f32 %v1663_v7, %v1633_v53  ;;  %v1263_v43 = vpop.f32.mrb[7].mxu0 }
 0x227   : > { %v1264_v34 = vadd.f32 %v1263_v43, %v1065_v2 }
 0x228   : > { %v1323_v30 = vadd.f32 %v2769_v20, %v1269_v50 }
 0x229   : > { %v1322_v18 = vadd.f32 %v2774_v27, %v1264_v34 }
 0x22a   : > { %1339 = vst [vmem:[%s2762_s25 + $0x38] sm:$0xff] %v1323_v30 }
 0x22b   : > { %1338 = vst [vmem:[%s2762_s25 + $0x30] sm:$0xff] %v1322_v18 }
 0x243   : > { %v1642_v8 = vpop.f32.mrb[12].mxu1 }
 0x244   : > { %v1095_v35 = vpop.f32.mrb[13].mxu1 }
 0x245   : > { %v1666_v24 = vpop.f32.mrb[8].mxu0 }
 0x246   : > { %v1279_v36 = vadd.f32 %v1666_v24, %v1636_v62  ;;  %v1273_v59 = vpop.f32.mrb[9].mxu0 }
 0x247   : > { %v1274_v37 = vadd.f32 %v1273_v59, %v1075_v33 }
 0x248   : > { %v1325_v14 = vadd.f32 %v2753_v16, %v1279_v36 }
 0x249   : > { %v1324_v38 = vadd.f32 %v2758_v22, %v1274_v37 }
 0x24a   : > { %1341 = vst [vmem:[%s2762_s25 + $0x48] sm:$0xff] %v1325_v14 }
 0x24b   : > { %1340 = vst [vmem:[%s2762_s25 + $0x40] sm:$0xff] %v1324_v38 }
 0x257   : > { %v1645_v52 = vpop.f32.mrb[14].mxu1 }
 0x258   : > { %v1105_v47 = vpop.f32.mrb[15].mxu1 }
 0x259   : > { %v1669_v29 = vpop.f32.mrb[10].mxu0 }
 0x25a   : > { %v1289_v63 = vadd.f32 %v1669_v29, %v1639_v48  ;;  %v1283_v15 = vpop.f32.mrb[11].mxu0 }
 0x25b   : > { %v1284_v41 = vadd.f32 %v1283_v15, %v1085_v0 }
 0x25c   : > { %v1327_v23 = vadd.f32 %v2769_v20, %v1289_v63 }
 0x25d   : > { %v1326_v17 = vadd.f32 %v2774_v27, %v1284_v41 }
 0x25e   : > { %1343 = vst [vmem:[%s2762_s25 + $0x58] sm:$0xff] %v1327_v23 }
 0x25f   : > { %1342 = vst [vmem:[%s2762_s25 + $0x50] sm:$0xff] %v1326_v17 }
 0x261   : > { %v1672_v28 = vpop.f32.mrb[12].mxu0 }
 0x262   : > { %v1299_v4 = vadd.f32 %v1672_v28, %v1642_v8  ;;  %v1293_v45 = vpop.f32.mrb[13].mxu0 }
 0x263   : > { %v1294_v19 = vadd.f32 %v1293_v45, %v1095_v35 }
 0x264   : > { %v1329_v13 = vadd.f32 %v2753_v16, %v1299_v4 }
 0x265   : > { %v1328_v60 = vadd.f32 %v2758_v22, %v1294_v19 }
 0x266   : > { %1345 = vst [vmem:[%s2762_s25 + $0x68] sm:$0xff] %v1329_v13 }
 0x267   : > { %1344 = vst [vmem:[%s2762_s25 + $0x60] sm:$0xff] %v1328_v60 }
 0x269   : > { %v1675_v55 = vpop.f32.mrb[14].mxu0 }
 0x26a   : > { %v1309_v9 = vadd.f32 %v1675_v55, %v1645_v52  ;;  %v1303_v56 = vpop.f32.mrb[15].mxu0 }
 0x26b   : > { %v1304_v21 = vadd.f32 %v1303_v56, %v1105_v47 }
 0x26c   : > { %v1331_v10 = vadd.f32 %v2769_v20, %v1309_v9 }
 0x26d   : > { %v1330_v16 = vadd.f32 %v2774_v27, %v1304_v21 }
 0x26e   : > { %1347 = vst [vmem:[%s2762_s25 + $0x78] sm:$0xff] %v1331_v10 }
 0x26f   : > { %1346 = vst [vmem:[%s2762_s25 + $0x70] sm:$0xff] %v1330_v16 }
 0x270   : > { %1832 = shalt.err (!%p1829_p3)
}
 0x271   : > { %s1833_s12 = scalar_lea.hbm %s2806_s15, 2048  ;;  %s1837_s26 = scalar_lea.hbm %s2861_s5, 4096 }
 0x272   : > { %p1834_p4 = scmp.ne.s32.totalorder %s2806_s15, %s1833_s12  ;;  %p1838_p9 = scmp.lt.u32.totalorder %s2806_s15, %s2861_s5 }
 0x273   : > { %p1839_p10 = scmp.lt.u32.totalorder %s1837_s26, %s1833_s12  ;;  %p1841_p12 = scmp.lt.u32.totalorder %s1833_s12, %s2806_s15 }
 0x274   : > { %p1835_p7 = pnand %p1834_p4, %p1961_p5 }
 0x275   : > { %p1840_p11 = por %p1839_p10, %p1838_p9 }
 0x276   : > { %p1836_p8 = pneg %p1835_p7 }
 0x277   : > { %p1842_p13 = por %p1841_p12, %p1840_p11 }
 0x279   : > { %p1843_p0 = pnand %p1842_p13, %p1836_p8 }
 0x27b   : > { %1846 = shalt.err (!%p1843_p0)
}
 0x27c   : > { %s1891_s6 = smov 128   ;;  %s1892_s7 = smov 8  }
 0x27d   : > { %1728 = dma.vmem_to_hbm [thread:$0]  (%p1961_p5), %s2808_s8, 2048, %s2806_s15, %s2815_s22, %s1891_s6, %s1891_s6, %s1892_s7  }
 0x27e PF: > { %p1734_p1 = scmp.ge.s32.totalorder %s1881_s21, 2  ;;  %s1378_s10 = sand.u32 1, %s1869_s18  }
 0x27f   : > { %s1379_s11 = scalar_lea.sflag [#allocation3], %s1378_s10 }
 0x280   : > { %p1731_p2 = pnand %p1734_p1, %p1965_p6 }
 0x282   : > { %1864 = dma.done.wait (!%p1731_p2), %s1379_s11, 2048  }
 0x283   : > { %1866 = vsyncadd (!%p1731_p2), %s1379_s11, 4294965248  ;;  %p15_p3 = scmp.ge.s32.totalorder %s1948_s24, 4   ;;  %s2877_s18 = smov %s1873_s19 }
 0x284   : > { %s2878_s19 = smov %s1877_s20  ;;  %s2879_s20 = smov %s1959_s27 }
 0x285   : > { %s2880_s21 = smov %s1948_s24  ;;  %17 = sbr.rel (!%p15_p3) target bundleno = 3 (0x3), region = 78 }
 0x28c   :  { %1384 = vsyncpa [#allocation3], 1 }
 0x28d   :  { %1386 = vsyncpa [#allocation3 + $0x1], 1 }

</bundles_post_ra>
